<compile_context>
chip_gen: v7x
topology: tpu7x:2x2x1
jax: 0.10.0
libtpu: 0.0.40
codegen_flags: <defaults>
</compile_context>

<pallas_src>
import math
import functools

import jax
import jax.numpy as jnp
from jax.experimental import pallas as pl
from jax.experimental.pallas import tpu as pltpu


def _round_up(x: int, m: int) -> int:
    return ((x + m - 1) // m) * m


def _vmem_budget_bytes() -> int:
    """VMEM budget derived from the chip, with a conservative (v7x) fallback."""
    try:
        cap = int(pltpu.get_tpu_info().vmem_capacity_bytes)
    except Exception:
        cap = 64 * 1024 * 1024  # v7x physical VMEM per TensorCore
    return max(16 * 1024 * 1024, (cap * 3) // 4)


# ---------------------------------------------------------------------------
# Primary kernel: in-VMEM gather (O(T*D) work, no MXU, no one-hot).
# ---------------------------------------------------------------------------
def _embed_take_kernel(ids_ref, emb_ref, out_ref, *, scale):
    # ids_ref: (1, T) int32 token ids for this block (lane-dense row)
    # emb_ref: (V, Dp) embedding table, VMEM-resident across the whole grid
    # out_ref: (T, Dp) output rows for this block (unmasked lane-dense store)
    ids = ids_ref[0]                                       # (T,) int32
    # ids are pre-clamped in the wrapper; mode="clip" keeps the gather simple.
    rows = jnp.take(emb_ref[...], ids, axis=0, mode="clip")  # (T, Dp) gather
    out_ref[...] = (rows * scale).astype(out_ref.dtype)


# ---------------------------------------------------------------------------
# Fallback kernel: scalar-prefetched SMEM ids + per-row dynamic-slice copy.
# Always lowers; only used if the gather path is unsupported by the compiler.
# ---------------------------------------------------------------------------
def _embed_loop_kernel(ids_smem, emb_ref, out_ref, *, scale, block_tokens):
    base = pl.program_id(0) * block_tokens

    def body(j, carry):
        tok = ids_smem[base + j]                           # scalar id from SMEM
        row = emb_ref[pl.ds(tok, 1), :]                    # (1, Dp) dynamic row
        out_ref[pl.ds(j, 1), :] = (row * scale).astype(out_ref.dtype)
        return carry

    jax.lax.fori_loop(0, block_tokens, body, 0)


# ---------------------------------------------------------------------------
# pallas_call builders.
# ---------------------------------------------------------------------------
def _call_take(ids_blocks, emb, t, n_blocks, d_pad, scale, vmem_limit,
               single_buffer_table):
    v = emb.shape[0]
    table_kwargs = {}
    if single_buffer_table:
        # The table block is grid-invariant (constant index_map); single
        # buffering halves its VMEM footprint (matters on v7x's 64 MiB).
        table_kwargs = dict(pipeline_mode=pl.Buffered(1))
    return pl.pallas_call(
        functools.partial(_embed_take_kernel, scale=scale),
        out_shape=jax.ShapeDtypeStruct((n_blocks * t, d_pad), emb.dtype),
        grid_spec=pltpu.PrefetchScalarGridSpec(
            num_scalar_prefetch=0,
            grid=(n_blocks,),                              # one token block / step
            in_specs=[
                pl.BlockSpec((1, t), lambda i: (i, 0)),    # lane-dense ids row
                pl.BlockSpec((v, d_pad), lambda i: (0, 0), **table_kwargs),
            ],
            out_specs=pl.BlockSpec((t, d_pad), lambda i: (i, 0)),
        ),
        compiler_params=pltpu.CompilerParams(
            dimension_semantics=("parallel",),             # independent blocks
            vmem_limit_bytes=vmem_limit,
        ),
    )(ids_blocks, emb)


def _call_loop(flat_ids, emb, t, n_blocks, d_pad, scale, vmem_limit):
    v = emb.shape[0]
    return pl.pallas_call(
        functools.partial(_embed_loop_kernel, scale=scale, block_tokens=t),
        out_shape=jax.ShapeDtypeStruct((n_blocks * t, d_pad), emb.dtype),
        grid_spec=pltpu.PrefetchScalarGridSpec(
            num_scalar_prefetch=1,                         # ids land in SMEM
            grid=(n_blocks,),
            in_specs=[pl.BlockSpec((v, d_pad), lambda i, ids: (0, 0))],
            out_specs=pl.BlockSpec((t, d_pad), lambda i, ids: (i, 0)),
        ),
        compiler_params=pltpu.CompilerParams(
            dimension_semantics=("parallel",),
            vmem_limit_bytes=vmem_limit,
        ),
    )(flat_ids, emb)


# ---------------------------------------------------------------------------
# Public wrapper.
# ---------------------------------------------------------------------------
def idx_to_embedding(token_idx: jax.Array, emb_table: jax.Array,
                     *, block_tokens: int = 512) -> jax.Array:
    """token_idx: [B, S] integer ids; emb_table: [V, D] -> [B, S, D]."""
    B, S = token_idx.shape
    V, D = emb_table.shape
    n_tok = B * S
    scale = math.sqrt(float(D))

    # Pad feat dim to a multiple of 128: unmasked lane-dense (T, Dp) stores.
    d_pad = _round_up(D, 128)
    emb = emb_table if d_pad == D else jnp.pad(
        emb_table, ((0, 0), (0, d_pad - D)))

    # Clamp ids so out-of-range tokens can never select garbage rows.
    # (nn.Embedding would raise instead -- deliberate, documented difference.)
    flat_ids = jnp.clip(token_idx.reshape(n_tok).astype(jnp.int32), 0, V - 1)

    # Token block: multiple of 8 sublanes, default 512; small inputs -> 1 block.
    t = min(_round_up(block_tokens, 8), _round_up(n_tok, 8))
    n_pad = _round_up(n_tok, t)
    if n_pad != n_tok:
        flat_ids = jnp.pad(flat_ids, (0, n_pad - n_tok))
    n_blocks = n_pad // t

    # VMEM residency check: 2x table (double-buffered worst case; the
    # Buffered(1) path needs only 1x) + double-buffered output/ids blocks.
    vmem_limit = _vmem_budget_bytes()
    itemsize = emb.dtype.itemsize
    working = (2 * V * d_pad * itemsize          # resident table (worst case)
               + 4 * t * d_pad * itemsize        # out blocks + gather temp
               + 2 * t * 4)                      # ids blocks
    if working > vmem_limit:
        # TODO(synk): for vocabularies too large to keep VMEM-resident, switch
        # to an HBM table (memory_space=pl.ANY) + scalar-prefetched ids with a
        # double-buffered per-row DMA gather (~n_tok*D HBM traffic, not V*D).
        raise ValueError(
            f"embedding working set {working} B exceeds VMEM budget "
            f"{vmem_limit} B; tile the table or use a row-DMA gather")

    ids_blocks = flat_ids.reshape(n_blocks, t)

    attempts = (
        lambda: _call_take(ids_blocks, emb, t, n_blocks, d_pad, scale,
                           vmem_limit, single_buffer_table=True),
        lambda: _call_take(ids_blocks, emb, t, n_blocks, d_pad, scale,
                           vmem_limit, single_buffer_table=False),
        lambda: _call_loop(flat_ids, emb, t, n_blocks, d_pad, scale,
                           vmem_limit),
    )

    out_flat = None
    last_err = None
    for thunk in attempts:
        try:
            out_flat = jax.block_until_ready(thunk())
            break
        except Exception as e:  # lowering/compile not supported -> next variant
            last_err = e
    if out_flat is None:
        raise last_err

    return out_flat[:n_tok, :D].reshape(B, S, D)


if __name__ == "__main__":
    # config.vocab_size = 32, config.feat_size = 128 (small synthetic shapes)
    VOCAB, FEAT = 32, 128
    B, S = 2, 8

    key = jax.random.PRNGKey(0)
    k_emb, k_idx = jax.random.split(key)

    # deterministic parameter init (nn.Embedding weight ~ N(0, 1))
    emb_table = jax.random.normal(k_emb, (VOCAB, FEAT), dtype=jnp.float32)
    token_idx = jax.random.randint(k_idx, (B, S), 0, VOCAB, dtype=jnp.int32)

    out = idx_to_embedding(token_idx, emb_table)
    out = jax.block_until_ready(out)

    # reference check (plain JAX)
    ref = emb_table[token_idx] * math.sqrt(float(FEAT))
    assert out.shape == (B, S, FEAT)
    assert jnp.allclose(out, ref, atol=1e-5, rtol=1e-5)

    print("KERNEL_OK")
</pallas_src>

<mosaic_0001>
module attributes {stable_mosaic.version = 11 : i64} {
  func.func @_embed_loop_kernel(%arg0: i32, %arg1: memref<16xi32, #tpu.memory_space<smem>>, %arg2: memref<32x128xf32, #tpu.memory_space<vmem>>, %arg3: memref<16x128xf32, #tpu.memory_space<vmem>>) attributes {dimension_semantics = [#tpu.dimension_semantics<parallel>], iteration_bounds = array<i64: 1>, scalar_prefetch = 1 : i64, scratch_operands = 0 : i64, tpu.core_type = #tpu.core_type<tc>, window_params = [{pipeline_mode = #tpu.pipeline_mode<synchronous>, transform_indices = @transform_0, window_bounds = array<i64: 32, 128>}, {transform_indices = @transform_1, window_bounds = array<i64: 16, 128>}]} {
    %c16_i32 = arith.constant 16 : i32
    %0 = arith.muli %arg0, %c16_i32 : i32
    %c0_i32 = arith.constant 0 : i32
    %c16_i32_0 = arith.constant 16 : i32
    %1 = arith.addi %c0_i32, %c16_i32_0 : i32
    %c1_i32 = arith.constant 1 : i32
    scf.for %arg4 = %c0_i32 to %1 step %c1_i32  : i32 {
      %2 = arith.addi %0, %arg4 : i32
      %3 = arith.index_cast %2 : i32 to index
      %4 = memref.load %arg1[%3] : memref<16xi32, #tpu.memory_space<smem>>
      %5 = arith.index_cast %4 : i32 to index
      %c0 = arith.constant 0 : index
      %6 = vector.load %arg2[%5, %c0] : memref<32x128xf32, #tpu.memory_space<vmem>>, vector<1x128xf32>
      %cst = arith.constant 11.3137083 : f32
      %7 = vector.broadcast %cst : f32 to vector<1x128xf32>
      %8 = arith.mulf %6, %7 : vector<1x128xf32>
      %9 = arith.index_cast %arg4 : i32 to index
      %c0_2 = arith.constant 0 : index
      %10 = vector.load %arg3[%9, %c0_2] : memref<16x128xf32, #tpu.memory_space<vmem>>, vector<1x128xf32>
      tpu.vector_store %arg3[%9, %c0_2], %8 {strides = array<i32>} : memref<16x128xf32, #tpu.memory_space<vmem>>, vector<1x128xf32>,
    }
    %c16_i32_1 = arith.constant 16 : i32
    return
  }
  func.func @transform_0(%arg0: i32, %arg1: memref<16xi32, #tpu.memory_space<smem>>) -> (i32, i32) {
    %c0_i32 = arith.constant 0 : i32
    %c0_i32_0 = arith.constant 0 : i32
    %c0_i32_1 = arith.constant 0 : i32
    return %c0_i32, %c0_i32_0 : i32, i32
  }
  func.func @transform_1(%arg0: i32, %arg1: memref<16xi32, #tpu.memory_space<smem>>) -> (i32, i32) {
    %c0_i32 = arith.constant 0 : i32
    %c0_i32_0 = arith.constant 0 : i32
    return %arg0, %c0_i32 : i32, i32
  }
}

</mosaic_0001>

<bundles_post_ra>
// kernel: tpu_custom_call.1
= control target key start
LH: loop header
LB: loop body
LE: loop exit
PB: predicated region body
PF: predicated region fallthrough
CT: control target
= control target key end

     0   :  { %s209_s0 = inlined_call_operand.hbm [shape: s32[16], index: 0, kind: input, shape index: {}]   ;;  %s210_s1 = inlined_call_operand.hbm [shape: f32[32,128], index: 1, kind: input, shape index: {}]   ;;  %s211_s2 = inlined_call_operand.hbm [shape: f32[16,128], index: 2, kind: output, shape index: {}]  }
   0x1   :  { %s79_s11 = scalar_lea.hbm %s209_s0, 16 }
   0x2   :  { %p80_p0 = scmp.ne.s32.totalorder %s209_s0, %s79_s11  ;;  %p83_p1 = scmp.lt.u32.totalorder %s79_s11, %s209_s0 }
   0x4   :  { %p85_p2 = pnand %p83_p1, %p80_p0 }
   0x6   :  { %88 = shalt.err (!%p85_p2)  }
   0x7   :  { %s147_s16 = smov [#allocation3]  }
   0x8   :  { %8 = dma.hbm_to_smem %s209_s0, 16, %s147_s16, [#allocation2] }
   0x9   :  { %137 = dma.done.wait [#allocation2], 16 }
   0xa   :  { %138 = vsyncadd [#allocation2], 4294967280 }
   0xb   :  { %10 = sfence }
   0xc   :  { %11 = vsyncpa [#allocation5], 0 }
   0xd   :  { %12 = vsyncpa [#allocation6], 0  ;;  %s148_s19 = smov [#allocation4]   ;;  %s89_s23 = scalar_lea.hbm %s210_s1, 512 }
   0xe   :  { %s18_s20 = sshll.u32 %s148_s19, 4  ;;  %p90_p3 = scmp.ne.s32.totalorder %s210_s1, %s89_s23  ;;  %s19_s20 = int_to_ptr.vmem [resolvable:$true] %s18_s20 }
   0xf   :  { %p93_p4 = scmp.lt.u32.totalorder %s89_s23, %s210_s1 }
  0x11   :  { %p95_p5 = pnand %p93_p4, %p90_p3 }
  0x13   :  { %98 = shalt.err (!%p95_p5)
}
  0x14   :  { %s99_s0 = scalar_lea.vmem %s19_s20, 512  ;;  %p104_p7 = scmp.lt.s32.totalorder %s19_s20, %s19_s20 }
  0x15   :  { %p100_p6 = scmp.ne.s32.totalorder %s19_s20, %s99_s0  ;;  %p105_p8 = scmp.lt.s32.totalorder %s99_s0, %s99_s0 }
  0x17   :  { %p106_p9 = por %p105_p8, %p104_p7 }
  0x19   :  { %p107_p10 = pnand %p106_p9, %p100_p6 }
  0x1b   :  { %110 = shalt.err (!%p107_p10)
}
  0x1c   :  { %s149_s28 = smov 128   ;;  %s150_s29 = smov 8  }
  0x1d   :  { %24 = dma.hbm_to_vmem [thread:$0]  %s210_s1, 512, %s19_s20, [#allocation5], %s149_s28, %s149_s28, %s150_s29  }
  0x1e   :  { %139 = dma.done.wait [#allocation5], 512  }
  0x1f   :  { %140 = vsyncadd [#allocation5], 4294966784  ;;  %s143_s4 = smov 0  }
  0x20 LB: > { %s36_s5 = sld [smem:[#allocation3 + %s145_s4]]  ;;  %s40_s7 = scalar_lea.vmem [#allocation7], %s145_s4  ;;  %s145_s4 = sphi %s143_s4, %s34_s4  }
  0x21   : > { %s34_s4 = sadd.s32 1, %s145_s4  }
  0x22   : > { %p31_p11 = scmp.ge.s32.totalorder %s34_s4, 16  }
  0x23   :  { %s151_s8 = smov (%p31_p11), [#allocation7]  }
  0x24   :  { %33 = sbr.rel (!%p31_p11) target bundleno = 32 (0x20), region = 37  ;;  %s47_s9 = sshll.u32 (%p31_p11), %s151_s8, 4  ;;  %s48_s9 = int_to_ptr.vmem [resolvable:$true] %s47_s9 }
  0x25   :  { %s111_s1 = scalar_lea.vmem (%p31_p11), %s48_s9, 256  ;;  %p116_p13 = scmp.lt.s32.totalorder (%p31_p11), %s48_s9, %s48_s9 }
  0x26   : > { %s37_s6 = scalar_lea.vmem [#allocation4], %s36_s5  ;;  %p112_p12 = scmp.ne.s32.totalorder (%p31_p11), %s48_s9, %s111_s1 }
  0x27   : > { %v38_v0 = vld [vmem:[%s37_s6] sm:$0x1]  ;;  %p117_p0 = scmp.lt.s32.totalorder (%p31_p11), %s111_s1, %s111_s1 }
  0x28   : > { %v39_v1 = vmul.f32 11.313708, %v38_v0 }
  0x29   :  { %p118_p1 = por (%p31_p11), %p117_p0, %p116_p13 }
  0x2a   : > { %41 = vst [vmem:[%s40_s7] sm:$0x1] %v39_v1 }
  0x2b   :  { %p119_p2 = pnand %p118_p1, %p112_p12 }
  0x2d   :  { %122 = shalt.err (!%p119_p2)
}
  0x2e   :  { %s123_s12 = scalar_lea.hbm %s211_s2, 256 }
  0x2f   :  { %p124_p3 = scmp.ne.s32.totalorder %s211_s2, %s123_s12  ;;  %p127_p4 = scmp.lt.u32.totalorder %s123_s12, %s211_s2 }
  0x31   :  { %p129_p5 = pnand %p127_p4, %p124_p3 }
  0x33   :  { %132 = shalt.err (!%p129_p5)
}
  0x34   :  { %53 = dma.vmem_to_hbm [thread:$0]  %s48_s9, 256, %s211_s2, [#allocation6], %s149_s28, %s149_s28, %s150_s29  }
  0x35   :  { %141 = dma.done.wait [#allocation6], 256  }
  0x36   :  { %142 = vsyncadd [#allocation6], 4294967040 }
  0x37   :  { %57 = vsyncpa [#allocation5], 1 }
  0x38   :  { %58 = vsyncpa [#allocation6], 1 }

</bundles_post_ra>
